<compile_context>
chip_gen: v7x
topology: tpu7x:2x2x1
jax: 0.10.0
libtpu: 0.0.40
codegen_flags: <defaults>
</compile_context>

<pallas_src>
import jax
import jax.numpy as jnp
from jax.experimental import pallas as pl
from jax.experimental.pallas import tpu as pltpu


def _round_up(x, m):
    return ((x + m - 1) // m) * m


def _pick_tile(dim, unit, target, single_block_cap):
    """Pick a HW-aligned tile: one block if it fits the cap (zero extra padding
    waste), otherwise the MXU-friendly target tile."""
    dp = _round_up(dim, unit)
    return dp if dp <= single_block_cap else target


# ----------------------------------------------------------------------------
# Base class: faithful translation of BaseNN semantics (no compute defined).
# ----------------------------------------------------------------------------
class BaseNN:
    def __init__(self, **kwargs):
        for key, value in kwargs.items():
            setattr(self, key, value)

    def load(self, state_dict):
        # TODO(synk): no torch state_dict / checkpoint loading in this synthetic script.
        for key, value in state_dict.items():
            setattr(self, key, value)

    def forward(self, *args, **kwargs):
        raise NotImplementedError("Not implement method 'forward'")

    def reinitialize_weights(self):
        raise NotImplementedError("Not implement method 'initialize_weights'")

    def get_embedding_size(self):
        raise NotImplementedError("Not implement method 'get_embedding_size'")

    def __call__(self, *args, **kwargs):
        return self.forward(*args, **kwargs)


# ----------------------------------------------------------------------------
# Pallas kernel: tiled fused linear + bias + ReLU with f32 accumulation.
# ----------------------------------------------------------------------------
def _dense_relu_kernel(x_ref, w_ref, b_ref, o_ref, acc_ref):
    k = pl.program_id(2)

    @pl.when(k == 0)
    def _init():
        acc_ref[...] = jnp.zeros_like(acc_ref)

    acc_ref[...] += jnp.dot(
        x_ref[...], w_ref[...], preferred_element_type=jnp.float32
    )

    @pl.when(k == pl.num_programs(2) - 1)
    def _finalize():
        out = acc_ref[...] + b_ref[...]            # bias added once per (i, j) tile
        o_ref[...] = jnp.maximum(out, 0.0).astype(o_ref.dtype)


def dense_relu_pallas(x, w, b):
    """relu(x @ w + b) with (M, N, K) tiling. x:[M,K], w:[K,N], b:[N] -> f32[M,N]."""
    M, K = x.shape
    K2, N = w.shape
    assert K == K2 and b.shape == (N,)

    # Tile selection: sublane unit 8 for M, lane unit 128 for K/N.  Single-block
    # caps are chosen so the full double-buffered working set stays a few MiB.
    tm = _pick_tile(M, 8, 256, 256)
    tk = _pick_tile(K, 128, 512, 1024)
    tn = _pick_tile(N, 128, 256, 512)

    M_pad = _round_up(M, tm)
    K_pad = _round_up(K, tk)
    N_pad = _round_up(N, tn)

    # Lane-dense, tile-aligned padding; padded K contributes 0 to the
    # accumulator, padded M rows / N cols are sliced off after the call.
    xp = x if (M_pad == M and K_pad == K) else jnp.pad(
        x, ((0, M_pad - M), (0, K_pad - K)))
    wp = w if (K_pad == K and N_pad == N) else jnp.pad(
        w, ((0, K_pad - K), (0, N_pad - N)))
    bp = (b if N_pad == N else jnp.pad(b, (0, N_pad - N)))
    bp = bp.astype(jnp.float32).reshape(1, N_pad)

    grid = (M_pad // tm, N_pad // tn, K_pad // tk)

    # VMEM budget: double-buffered input/output tiles + f32 accumulator, with
    # headroom; capped <= 48 MiB so it also fits v7x's 64 MiB physical VMEM.
    tile_bytes = (
        2 * (tm * tk * xp.dtype.itemsize + tk * tn * wp.dtype.itemsize + tn * 4)
        + 2 * tm * tn * 4   # output tile (double-buffered)
        + tm * tn * 4       # accumulator scratch
    )
    vmem_limit = int(min(max(4 * tile_bytes, 16 * 1024 * 1024), 48 * 1024 * 1024))

    in_bytes = (
        xp.size * xp.dtype.itemsize
        + wp.size * wp.dtype.itemsize
        + bp.size * bp.dtype.itemsize
    )
    out_bytes = M_pad * N_pad * 4

    out = pl.pallas_call(
        _dense_relu_kernel,
        out_shape=jax.ShapeDtypeStruct((M_pad, N_pad), jnp.float32),
        grid=grid,
        in_specs=[
            pl.BlockSpec((tm, tk), lambda i, j, k: (i, k)),
            pl.BlockSpec((tk, tn), lambda i, j, k: (k, j)),
            pl.BlockSpec((1, tn), lambda i, j, k: (0, j)),  # bias: no K dependence
        ],
        out_specs=pl.BlockSpec((tm, tn), lambda i, j, k: (i, j)),
        scratch_shapes=[pltpu.VMEM((tm, tn), jnp.float32)],
        compiler_params=pltpu.CompilerParams(
            dimension_semantics=("parallel", "parallel", "arbitrary"),
            vmem_limit_bytes=vmem_limit,
        ),
        cost_estimate=pl.CostEstimate(
            flops=2 * M_pad * N_pad * K_pad,
            transcendentals=0,
            bytes_accessed=int(in_bytes + out_bytes),
        ),
    )(xp, wp, bp)

    return out[:M, :N]


# ----------------------------------------------------------------------------
# Concrete subclass exercising the base-class contract with a Pallas forward.
# ----------------------------------------------------------------------------
class DenseNN(BaseNN):
    def __init__(self, in_features, out_features, seed=42, **kwargs):
        super().__init__(in_features=in_features, out_features=out_features, **kwargs)
        self._seed = seed
        self.reinitialize_weights()

    def reinitialize_weights(self):
        # Deterministic init (synthetic; no .pt/.pth loading).
        kw, kb = jax.random.split(jax.random.PRNGKey(self._seed))
        scale = 1.0 / jnp.sqrt(jnp.float32(self.in_features))
        # bf16 weights: native MXU input dtype on v5e/v6e/v7x; f32 accumulate in-kernel.
        self.weight = jax.random.uniform(
            kw, (self.in_features, self.out_features),
            dtype=jnp.float32, minval=-scale, maxval=scale,
        ).astype(jnp.bfloat16)
        self.bias = jax.random.uniform(
            kb, (self.out_features,),
            dtype=jnp.float32, minval=-scale, maxval=scale,
        )

    def forward(self, x):
        return dense_relu_pallas(x.astype(jnp.bfloat16), self.weight, self.bias)

    def get_embedding_size(self):
        return self.out_features


def _reference(x, model):
    xb = x.astype(jnp.bfloat16).astype(jnp.float32)
    wb = model.weight.astype(jnp.float32)
    return jnp.maximum(xb @ wb + model.bias, 0.0)


if __name__ == "__main__":
    # Sanity: base-class abstract methods still raise, as in the torch module.
    try:
        BaseNN(foo=1).forward(None)
        raise RuntimeError("BaseNN.forward should have raised")
    except NotImplementedError:
        pass

    key = jax.random.PRNGKey(0)
    k_small, k_large = jax.random.split(key)

    # Case 1: deliberately unaligned small shapes -> exercises M/K/N padding
    # and the single-block (1, 1, 1) grid path (K=600 -> tk=640, no wasted K).
    b1, din1, dout1 = 10, 600, 300
    x1 = jax.random.normal(k_small, (b1, din1), dtype=jnp.float32)
    m1 = DenseNN(in_features=din1, out_features=dout1, seed=42)
    out1 = jax.block_until_ready(m1(x1))
    ref1 = _reference(x1, m1)
    assert out1.shape == (b1, dout1)
    assert m1.get_embedding_size() == dout1
    assert jnp.allclose(out1, ref1, atol=2e-2, rtol=2e-2), float(
        jnp.max(jnp.abs(out1 - ref1)))

    # Case 2: aligned shapes -> multi-step grid (1, 3, 3): exercises the f32
    # accumulator across K steps and parallel N tiles, with zero padding waste.
    b2, din2, dout2 = 16, 1536, 768
    x2 = jax.random.normal(k_large, (b2, din2), dtype=jnp.float32)
    m2 = DenseNN(in_features=din2, out_features=dout2, seed=7)
    out2 = jax.block_until_ready(m2(x2))
    ref2 = _reference(x2, m2)
    assert out2.shape == (b2, dout2)
    assert jnp.allclose(out2, ref2, atol=5e-2, rtol=5e-2), float(
        jnp.max(jnp.abs(out2 - ref2)))

    print("KERNEL_OK")
</pallas_src>

<mosaic_0001>
module attributes {stable_mosaic.version = 11 : i64} {
  func.func @_dense_relu_kernel(%arg0: i32, %arg1: i32, %arg2: i32, %arg3: memref<16x640xbf16, #tpu.memory_space<vmem>>, %arg4: memref<640x384xbf16, #tpu.memory_space<vmem>>, %arg5: memref<1x384xf32, #tpu.memory_space<vmem>>, %arg6: memref<16x384xf32, #tpu.memory_space<vmem>>, %arg7: memref<16x384xf32, #tpu.memory_space<vmem>>) attributes {dimension_semantics = [#tpu.dimension_semantics<parallel>, #tpu.dimension_semantics<parallel>, #tpu.dimension_semantics<arbitrary>], iteration_bounds = array<i64: 1, 1, 1>, scalar_prefetch = 0 : i64, scratch_operands = 1 : i64, tpu.core_type = #tpu.core_type<tc>, window_params = [{transform_indices = @transform_0, window_bounds = array<i64: 16, 640>}, {transform_indices = @transform_1, window_bounds = array<i64: 640, 384>}, {transform_indices = @transform_2, window_bounds = array<i64: 1, 384>}, {transform_indices = @transform_3, window_bounds = array<i64: 16, 384>}]} {
    %c0_i32 = arith.constant 0 : i32
    %0 = arith.cmpi eq, %arg2, %c0_i32 : i32
    %1 = arith.extui %0 : i1 to i32
    %c0_i32_0 = arith.constant 0 : i32
    %2 = arith.cmpi ne, %1, %c0_i32_0 : i32
    scf.if %2 {
      %cst_10 = arith.constant 0.000000e+00 : f32
      %12 = vector.broadcast %cst_10 : f32 to vector<16x384xf32>
      %c0_11 = arith.constant 0 : index
      %c0_12 = arith.constant 0 : index
      %13 = vector.load %arg7[%c0_11, %c0_12] : memref<16x384xf32, #tpu.memory_space<vmem>>, vector<16x384xf32>
      tpu.vector_store %arg7[%c0_11, %c0_12], %12 {strides = array<i32>} : memref<16x384xf32, #tpu.memory_space<vmem>>, vector<16x384xf32>,
    } else {
    }
    %c0 = arith.constant 0 : index
    %c0_1 = arith.constant 0 : index
    %3 = vector.load %arg7[%c0, %c0_1] : memref<16x384xf32, #tpu.memory_space<vmem>>, vector<16x384xf32>
    %c0_2 = arith.constant 0 : index
    %c0_3 = arith.constant 0 : index
    %4 = vector.load %arg3[%c0_2, %c0_3] : memref<16x640xbf16, #tpu.memory_space<vmem>>, vector<16x640xbf16>
    %c0_4 = arith.constant 0 : index
    %c0_5 = arith.constant 0 : index
    %5 = vector.load %arg4[%c0_4, %c0_5] : memref<640x384xbf16, #tpu.memory_space<vmem>>, vector<640x384xbf16>
    %cst = arith.constant dense<0.000000e+00> : vector<16x384xf32>
    %6 = tpu.matmul %4, %5, %cst {dimension_numbers = #tpu.dot_dimension_numbers<[1], [0], [0], [1], [0, 0, 1, 1], [], []>} : vector<16x640xbf16>, vector<640x384xbf16>, vector<16x384xf32> -> vector<16x384xf32>
    %7 = arith.addf %3, %6 : vector<16x384xf32>
    %c0_6 = arith.constant 0 : index
    %c0_7 = arith.constant 0 : index
    %8 = vector.load %arg7[%c0_6, %c0_7] : memref<16x384xf32, #tpu.memory_space<vmem>>, vector<16x384xf32>
    tpu.vector_store %arg7[%c0_6, %c0_7], %7 {strides = array<i32>} : memref<16x384xf32, #tpu.memory_space<vmem>>, vector<16x384xf32>,
    %c0_i32_8 = arith.constant 0 : i32
    %9 = arith.cmpi eq, %arg2, %c0_i32_8 : i32
    %10 = arith.extui %9 : i1 to i32
    %c0_i32_9 = arith.constant 0 : i32
    %11 = arith.cmpi ne, %10, %c0_i32_9 : i32
    scf.if %11 {
      %c0_10 = arith.constant 0 : index
      %c0_11 = arith.constant 0 : index
      %12 = vector.load %arg7[%c0_10, %c0_11] : memref<16x384xf32, #tpu.memory_space<vmem>>, vector<16x384xf32>
      %c0_12 = arith.constant 0 : index
      %c0_13 = arith.constant 0 : index
      %13 = vector.load %arg5[%c0_12, %c0_13] : memref<1x384xf32, #tpu.memory_space<vmem>>, vector<1x384xf32>
      %14 = vector.broadcast %13 : vector<1x384xf32> to vector<16x384xf32>
      %15 = arith.addf %12, %14 : vector<16x384xf32>
      %cst_14 = arith.constant 0.000000e+00 : f32
      %16 = vector.broadcast %cst_14 : f32 to vector<16x384xf32>
      %17 = arith.maximumf %15, %16 : vector<16x384xf32>
      %c0_15 = arith.constant 0 : index
      %c0_16 = arith.constant 0 : index
      %18 = vector.load %arg6[%c0_15, %c0_16] : memref<16x384xf32, #tpu.memory_space<vmem>>, vector<16x384xf32>
      tpu.vector_store %arg6[%c0_15, %c0_16], %17 {strides = array<i32>} : memref<16x384xf32, #tpu.memory_space<vmem>>, vector<16x384xf32>,
    } else {
    }
    return
  }
  func.func @transform_0(%arg0: i32, %arg1: i32, %arg2: i32) -> (i32, i32) {
    %c0_i32 = arith.constant 0 : i32
    return %arg0, %arg2 : i32, i32
  }
  func.func @transform_1(%arg0: i32, %arg1: i32, %arg2: i32) -> (i32, i32) {
    %c0_i32 = arith.constant 0 : i32
    return %arg2, %arg1 : i32, i32
  }
  func.func @transform_2(%arg0: i32, %arg1: i32, %arg2: i32) -> (i32, i32) {
    %c0_i32 = arith.constant 0 : i32
    %c0_i32_0 = arith.constant 0 : i32
    return %c0_i32, %arg1 : i32, i32
  }
  func.func @transform_3(%arg0: i32, %arg1: i32, %arg2: i32) -> (i32, i32) {
    %c0_i32 = arith.constant 0 : i32
    return %arg0, %arg1 : i32, i32
  }
}

</mosaic_0001>

<bundles_post_ra>
// kernel: tpu_custom_call.1
= control target key start
LH: loop header
LB: loop body
LE: loop exit
PB: predicated region body
PF: predicated region fallthrough
CT: control target
= control target key end

     0   :  { %8 = vsyncpa [#allocation4], 0  ;;  %s1750_s0 = inlined_call_operand.hbm [shape: bf16[16,640], index: 0, kind: input, shape index: {}]   ;;  %s1751_s1 = inlined_call_operand.hbm [shape: bf16[640,384], index: 1, kind: input, shape index: {}]   ;;  %s1752_s2 = inlined_call_operand.vmem [shape: f32[1,384], index: 2, kind: input, shape index: {}]   ;;  %s1753_s3 = inlined_call_operand.hbm [shape: f32[16,384], index: 3, kind: output, shape index: {}]  }
   0x1   :  { %9 = vsyncpa [#allocation7], 0 }
   0x2   :  { %10 = vsyncpa [#allocation5], 0  ;;  %s1675_s12 = smov [#allocation3]   ;;  %s1603_s16 = scalar_lea.hbm %s1750_s0, 640 }
   0x3   :  { %s16_s13 = sshll.u32 %s1675_s12, 4  ;;  %p1604_p0 = scmp.ne.s32.totalorder %s1750_s0, %s1603_s16  ;;  %s17_s13 = int_to_ptr.vmem [resolvable:$true] %s16_s13 }
   0x4   :  { %p1607_p1 = scmp.lt.u32.totalorder %s1603_s16, %s1750_s0 }
   0x6   :  { %p1609_p2 = pnand %p1607_p1, %p1604_p0 }
   0x8   :  { %1612 = shalt.err (!%p1609_p2)
}
   0x9   :  { %s1613_s21 = scalar_lea.vmem %s17_s13, 640  ;;  %p1618_p4 = scmp.lt.s32.totalorder %s17_s13, %s17_s13 }
   0xa   :  { %p1614_p3 = scmp.ne.s32.totalorder %s17_s13, %s1613_s21  ;;  %p1619_p5 = scmp.lt.s32.totalorder %s1613_s21, %s1613_s21 }
   0xc   :  { %p1620_p6 = por %p1619_p5, %p1618_p4 }
   0xe   :  { %p1621_p7 = pnand %p1620_p6, %p1614_p3 }
  0x10   :  { %1624 = shalt.err (!%p1621_p7)
}
  0x11   :  { %s1676_s22 = smov 320   ;;  %s1677_s23 = smov 20  }
  0x12   :  { %22 = dma.hbm_to_vmem [thread:$0]  %s1750_s0, 640, %s17_s13, [#allocation4], %s1676_s22, %s1676_s22, %s1677_s23  }
  0x13   :  { %s1678_s26 = smov [#allocation6]   ;;  %s1625_s30 = scalar_lea.hbm %s1751_s1, 15360 }
  0x14   :  { %s28_s27 = sshll.u32 %s1678_s26, 4  ;;  %p1626_p8 = scmp.ne.s32.totalorder %s1751_s1, %s1625_s30  ;;  %s29_s27 = int_to_ptr.vmem [resolvable:$true] %s28_s27 }
  0x15   :  { %p1629_p9 = scmp.lt.u32.totalorder %s1625_s30, %s1751_s1 }
  0x17   :  { %p1631_p10 = pnand %p1629_p9, %p1626_p8 }
  0x19   :  { %1634 = shalt.err (!%p1631_p10)
}
  0x1a   :  { %s1635_s8 = scalar_lea.vmem %s29_s27, 15360  ;;  %p1640_p12 = scmp.lt.s32.totalorder %s29_s27, %s29_s27 }
  0x1b   :  { %p1636_p11 = scmp.ne.s32.totalorder %s29_s27, %s1635_s8  ;;  %p1641_p13 = scmp.lt.s32.totalorder %s1635_s8, %s1635_s8 }
  0x1d   :  { %p1642_p0 = por %p1641_p13, %p1640_p12 }
  0x1f   :  { %p1643_p1 = pnand %p1642_p0, %p1636_p11 }
  0x21   :  { %1646 = shalt.err (!%p1643_p1)
}
  0x22   :  { %s1679_s0 = smov 192   ;;  %s1680_s9 = smov 12  }
  0x23   :  { %34 = dma.hbm_to_vmem [thread:$0]  %s1751_s1, 15360, %s29_s27, [#allocation7], %s1679_s0, %s1679_s0, %s1680_s9  }
  0x24   :  { %1669 = dma.done.wait [#allocation4], 640  }
  0x25   :  { %1670 = vsyncadd [#allocation4], 4294966656 }
  0x26   :  { %1671 = dma.done.wait [#allocation7], 15360  }
  0x27   :  { %1672 = vsyncadd [#allocation7], 4294951936  ;;  %v1681_v0 = vmov 0   ;;  %v1436_v1 = vld [vmem:[#allocation6 + $0x4] ss:$12 sps:$4 sm:$0xff]   ;;  %vm1683_vm0 = vmmov 0  }
  0x28   :  { %1010 = vmatprep.mubr.bf16.mxu1 %v1681_v0  ;;  %v1438_v2 = vld [vmem:[#allocation6 + $0x304] ss:$12 sps:$4 sm:$0xff]   ;;  %892 = vmatprep.subr.bf16.mxu0 %v1436_v1  ;;  %v1440_v3 = vld [vmem:[#allocation6] ss:$12 sps:$4 sm:$0xff]   ;;  %v1442_v5 = vld [vmem:[#allocation6 + $0x1c] ss:$12 sps:$4 sm:$0xff]  }
  0x29   :  { %v1441_v4 = vld [vmem:[#allocation6 + $0x300] ss:$12 sps:$4 sm:$0xff]   ;;  %978 = vmatprep.subr.bf16.mxu1 %v1438_v2  ;;  %893 = vmatpush1.bf16.msra.mxu0 %v1440_v3  ;;  %v1444_v6 = vld [vmem:[#allocation6 + $0x31c] ss:$12 sps:$4 sm:$0xff]   ;;  %v1446_v7 = vld [vmem:[#allocation6 + $0x18] ss:$12 sps:$4 sm:$0xff]  }
  0x2a   :  { %979 = vmatpush1.bf16.msra.mxu1 %v1441_v4  ;;  %894 = vmatprep.subr.bf16.mxu0 %v1442_v5  ;;  %v1447_v8 = vld [vmem:[#allocation6 + $0x318] ss:$12 sps:$4 sm:$0xff]   ;;  %v1448_v9 = vld [vmem:[#allocation6 + $0x34] ss:$12 sps:$4 sm:$0xff]   ;;  %v1452_v11 = vld [vmem:[#allocation6 + $0x30] ss:$12 sps:$4 sm:$0xff]  }
  0x2b   :  { %980 = vmatprep.subr.bf16.mxu1 %v1444_v6  ;;  %v1450_v10 = vld [vmem:[#allocation6 + $0x334] ss:$12 sps:$4 sm:$0xff]   ;;  %v1453_v12 = vld [vmem:[#allocation6 + $0x330] ss:$12 sps:$4 sm:$0xff]   ;;  %v1454_v13 = vld [vmem:[#allocation6 + $0x4c] ss:$12 sps:$4 sm:$0xff]  }
  0x2c   :  { %v1456_v14 = vld [vmem:[#allocation6 + $0x34c] ss:$12 sps:$4 sm:$0xff]   ;;  %v1458_v15 = vld [vmem:[#allocation6 + $0x48] ss:$12 sps:$4 sm:$0xff]   ;;  %v1460_v17 = vld [vmem:[#allocation6 + $0x64] ss:$12 sps:$4 sm:$0xff]  }
  0x2d   :  { %895 = vmatpush1.bf16.msra.mxu0 %v1446_v7  ;;  %v1459_v16 = vld [vmem:[#allocation6 + $0x348] ss:$12 sps:$4 sm:$0xff]   ;;  %v1462_v18 = vld [vmem:[#allocation6 + $0x364] ss:$12 sps:$4 sm:$0xff]   ;;  %v1464_v19 = vld [vmem:[#allocation6 + $0x60] ss:$12 sps:$4 sm:$0xff]  }
  0x2e   :  { %981 = vmatpush1.bf16.msra.mxu1 %v1447_v8  ;;  %896 = vmatprep.subr.bf16.mxu0 %v1448_v9  ;;  %v1465_v20 = vld [vmem:[#allocation6 + $0x360] ss:$12 sps:$4 sm:$0xff]   ;;  %v1466_v21 = vld [vmem:[#allocation6 + $0x7c] ss:$12 sps:$4 sm:$0xff]   ;;  %v1470_v23 = vld [vmem:[#allocation6 + $0x78] ss:$12 sps:$4 sm:$0xff]  }
  0x2f   :  { %982 = vmatprep.subr.bf16.mxu1 %v1450_v10  ;;  %v1468_v22 = vld [vmem:[#allocation6 + $0x37c] ss:$12 sps:$4 sm:$0xff]   ;;  %v1471_v24 = vld [vmem:[#allocation6 + $0x378] ss:$12 sps:$4 sm:$0xff]   ;;  %v1472_v25 = vld [vmem:[#allocation6 + $0x94] ss:$12 sps:$4 sm:$0xff]  }
  0x30   :  { %v1474_v26 = vld [vmem:[#allocation6 + $0x394] ss:$12 sps:$4 sm:$0xff]   ;;  %v1476_v27 = vld [vmem:[#allocation6 + $0x90] ss:$12 sps:$4 sm:$0xff]   ;;  %v1478_v29 = vld [vmem:[#allocation6 + $0xac] ss:$12 sps:$4 sm:$0xff]  }
  0x31   :  { %897 = vmatpush1.bf16.msra.mxu0 %v1452_v11  ;;  %v1477_v28 = vld [vmem:[#allocation6 + $0x390] ss:$12 sps:$4 sm:$0xff]   ;;  %v1480_v30 = vld [vmem:[#allocation6 + $0x3ac] ss:$12 sps:$4 sm:$0xff]   ;;  %v1482_v31 = vld [vmem:[#allocation6 + $0xa8] ss:$12 sps:$4 sm:$0xff]  }
  0x32   :  { %983 = vmatpush1.bf16.msra.mxu1 %v1453_v12  ;;  %898 = vmatprep.subr.bf16.mxu0 %v1454_v13  ;;  %v1483_v32 = vld [vmem:[#allocation6 + $0x3a8] ss:$12 sps:$4 sm:$0xff]   ;;  %v1484_v33 = vld [vmem:[#allocation6 + $0xc4] ss:$12 sps:$4 sm:$0xff]   ;;  %v1488_v36 = vld [vmem:[#allocation6 + $0xc0] ss:$12 sps:$4 sm:$0xff]  }
  0x33   :  { %984 = vmatprep.subr.bf16.mxu1 %v1456_v14  ;;  %v1731_v34 = vld [vmem:[#allocation3 + $0x10] ss:$20 sps:$4 sm:$0xff]   ;;  %v1492_v39 = vld [vmem:[#allocation6 + $0xe0] ss:$12 sps:$4 sm:$0xff]   ;;  %v1493_v40 = vld [vmem:[#allocation6 + $0xd8] ss:$12 sps:$4 sm:$0xff]  }
  0x34   :  { %v1487_v35 = vld [vmem:[#allocation6 + $0xc8] ss:$12 sps:$4 sm:$0xff]   ;;  %v1494_v41 = vld [vmem:[#allocation6 + $0x20] ss:$12 sps:$4 sm:$0xff]   ;;  %v1497_v43 = vld [vmem:[#allocation6 + $0xf8] ss:$12 sps:$4 sm:$0xff]  }
  0x35   :  { %899 = vmatpush1.bf16.msra.mxu0 %v1458_v15  ;;  %v1489_v37 = vld [vmem:[#allocation6 + $0x8] ss:$12 sps:$4 sm:$0xff]   ;;  %v1498_v44 = vld [vmem:[#allocation6 + $0xf0] ss:$12 sps:$4 sm:$0xff]   ;;  %v1499_v45 = vld [vmem:[#allocation6 + $0x38] ss:$12 sps:$4 sm:$0xff]  }
  0x36   :  { %985 = vmatpush1.bf16.msra.mxu1 %v1459_v16  ;;  %900 = vmatprep.subr.bf16.mxu0 %v1460_v17  ;;  %v1490_v38 = vld [vmem:[#allocation6 + $0xdc] ss:$12 sps:$4 sm:$0xff]   ;;  %v1495_v42 = vld [vmem:[#allocation6 + $0xf4] ss:$12 sps:$4 sm:$0xff]   ;;  %v1500_v46 = vld [vmem:[#allocation6 + $0x10c] ss:$12 sps:$4 sm:$0xff]  }
  0x37   :  { %986 = vmatprep.subr.bf16.mxu1 %v1462_v18  ;;  %v1502_v47 = vld [vmem:[#allocation6 + $0x110] ss:$12 sps:$4 sm:$0xff]   ;;  %v1503_v48 = vld [vmem:[#allocation6 + $0x108] ss:$12 sps:$4 sm:$0xff]   ;;  %v1508_v52 = vld [vmem:[#allocation6 + $0x120] ss:$12 sps:$4 sm:$0xff]  }
  0x38   :  { %v1504_v49 = vld [vmem:[#allocation6 + $0x50] ss:$12 sps:$4 sm:$0xff]   ;;  %v1507_v51 = vld [vmem:[#allocation6 + $0x128] ss:$12 sps:$4 sm:$0xff]   ;;  %v1512_v55 = vld [vmem:[#allocation6 + $0x140] ss:$12 sps:$4 sm:$0xff]  }
  0x39   :  { %901 = vmatpush1.bf16.msra.mxu0 %v1464_v19  ;;  %v1505_v50 = vld [vmem:[#allocation6 + $0x124] ss:$12 sps:$4 sm:$0xff]   ;;  %v1509_v53 = vld [vmem:[#allocation6 + $0x68] ss:$12 sps:$4 sm:$0xff]   ;;  %v1514_v58 = vld [vmem:[#allocation6 + $0x80] ss:$12 sps:$4 sm:$0xff]  }
  0x3a   :  { %987 = vmatpush1.bf16.msra.mxu1 %v1465_v20  ;;  %902 = vmatprep.subr.bf16.mxu0 %v1466_v21  ;;  %v1510_v54 = vld [vmem:[#allocation6 + $0x13c] ss:$12 sps:$4 sm:$0xff]   ;;  %v1513_v57 = vld [vmem:[#allocation6 + $0x138] ss:$12 sps:$4 sm:$0xff]   ;;  %v1515_v59 = vld [vmem:[#allocation6 + $0x154] ss:$12 sps:$4 sm:$0xff]  }
  0x3b   :  { %988 = vmatprep.subr.bf16.mxu1 %v1468_v22  ;;  %v1527_v56 = vld [vmem:[#allocation3 + $0x4] ss:$20 sps:$4 sm:$0xff]   ;;  %v1517_v60 = vld [vmem:[#allocation6 + $0x158] ss:$12 sps:$4 sm:$0xff]   ;;  %v1523_v1 = vld [vmem:[#allocation6 + $0x168] ss:$12 sps:$4 sm:$0xff]  }
  0x3c   :  { %v1518_v61 = vld [vmem:[#allocation6 + $0x150] ss:$12 sps:$4 sm:$0xff]   ;;  %924 = vmatprep.mubr.bf16.mxu0 %v1527_v56  ;;  %v1519_v62 = vld [vmem:[#allocation6 + $0x98] ss:$12 sps:$4 sm:$0xff]   ;;  %v1531_v4 = vld [vmem:[#allocation6 + $0x248] ss:$12 sps:$4 sm:$0xff]  }
  0x3d   :  { %903 = vmatpush1.bf16.msra.mxu0 %v1470_v23  ;;  %v1520_v63 = vld [vmem:[#allocation6 + $0x16c] ss:$12 sps:$4 sm:$0xff]   ;;  %v1522_v0 = vld [vmem:[#allocation6 + $0x170] ss:$12 sps:$4 sm:$0xff]   ;;  %v1532_v7 = vld [vmem:[#allocation6 + $0x188] ss:$12 sps:$4 sm:$0xff]  }
  0x3e   :  { %989 = vmatpush1.bf16.msra.mxu1 %v1471_v24  ;;  %904 = vmatprep.subr.bf16.mxu0 %v1472_v25  ;;  %v1524_v2 = vld [vmem:[#allocation6 + $0xb0] ss:$12 sps:$4 sm:$0xff]   ;;  %v1525_v5 = vld [vmem:[#allocation3] ss:$20 sps:$4 sm:$0xff]   ;;  %v1540_v12 = vld [vmem:[#allocation6 + $0x1b4] ss:$12 sps:$4 sm:$0xff]  }
  0x3f   :  { %990 = vmatprep.subr.bf16.mxu1 %v1474_v26  ;;  %v1530_v3 = vld [vmem:[#allocation6 + $0x184] ss:$12 sps:$4 sm:$0xff]   ;;  %v1528_v6 = vld [vmem:[#allocation6 + $0x180] ss:$12 sps:$4 sm:$0xff]   ;;  %v1535_v8 = vld [vmem:[#allocation6 + $0x19c] ss:$12 sps:$4 sm:$0xff]  }
  0x40   :  { %v1536_v9 = vld [vmem:[#allocation6 + $0x260] ss:$12 sps:$4 sm:$0xff]   ;;  %v1533_v10 = vld [vmem:[#allocation6 + $0x198] ss:$12 sps:$4 sm:$0xff]   ;;  %v1538_v14 = vld [vmem:[#allocation6 + $0x1b0] ss:$12 sps:$4 sm:$0xff]  }
  0x41   :  { %905 = vmatpush1.bf16.msra.mxu0 %v1476_v27  ;;  %v1537_v11 = vld [vmem:[#allocation6 + $0x1a0] ss:$12 sps:$4 sm:$0xff]   ;;  %v1541_v13 = vld [vmem:[#allocation6 + $0x278] ss:$12 sps:$4 sm:$0xff]   ;;  %v1546_v17 = vld [vmem:[#allocation6 + $0x290] ss:$12 sps:$4 sm:$0xff]  }
  0x42   :  { %991 = vmatpush1.bf16.msra.mxu1 %v1477_v28  ;;  %906 = vmatprep.subr.bf16.mxu0 %v1478_v29  ;;  %v1542_v15 = vld [vmem:[#allocation6 + $0x1b8] ss:$12 sps:$4 sm:$0xff]   ;;  %v1543_v18 = vld [vmem:[#allocation6 + $0x1c8] ss:$12 sps:$4 sm:$0xff]   ;;  %v1547_v19 = vld [vmem:[#allocation6 + $0x1d0] ss:$12 sps:$4 sm:$0xff]  }
  0x43   :  { %992 = vmatprep.subr.bf16.mxu1 %v1480_v30  ;;  %v1545_v16 = vld [vmem:[#allocation6 + $0x1cc] ss:$12 sps:$4 sm:$0xff]   ;;  %v1550_v20 = vld [vmem:[#allocation6 + $0x1e4] ss:$12 sps:$4 sm:$0xff]   ;;  %v1551_v21 = vld [vmem:[#allocation6 + $0x2a8] ss:$12 sps:$4 sm:$0xff]  }
  0x44   :  { %v1570_v22 = vld [vmem:[#allocation3 + $0xc] ss:$20 sps:$4 sm:$0xff]   ;;  %v1548_v23 = vld [vmem:[#allocation6 + $0x1e0] ss:$12 sps:$4 sm:$0xff]   ;;  %v1552_v24 = vld [vmem:[#allocation6 + $0x1e8] ss:$12 sps:$4 sm:$0xff]  }
  0x45   :  { %907 = vmatpush1.bf16.msra.mxu0 %v1482_v31  ;;  %v1555_v25 = vld [vmem:[#allocation6 + $0x1fc] ss:$12 sps:$4 sm:$0xff]   ;;  %v1556_v26 = vld [vmem:[#allocation6 + $0x2c0] ss:$12 sps:$4 sm:$0xff]   ;;  %v1553_v27 = vld [vmem:[#allocation6 + $0x1f8] ss:$12 sps:$4 sm:$0xff]  }
  0x46   :  { %993 = vmatpush1.bf16.msra.mxu1 %v1483_v32  ;;  %908 = vmatprep.subr.bf16.mxu0 %v1484_v33  ;;  %v1557_v28 = vld [vmem:[#allocation6 + $0x200] ss:$12 sps:$4 sm:$0xff]   ;;  %v1561_v30 = vld [vmem:[#allocation6 + $0x2d8] ss:$12 sps:$4 sm:$0xff]   ;;  %v1558_v31 = vld [vmem:[#allocation6 + $0x210] ss:$12 sps:$4 sm:$0xff]  }
  0x47   :  { %1343 = vmatprep.subr.bf16.mxu1 %v1487_v35  ;;  %v1560_v29 = vld [vmem:[#allocation6 + $0x214] ss:$12 sps:$4 sm:$0xff]   ;;  %v1562_v32 = vld [vmem:[#allocation6 + $0x218] ss:$12 sps:$4 sm:$0xff]   ;;  %v1566_v35 = vld [vmem:[#allocation6 + $0x2f0] ss:$12 sps:$4 sm:$0xff]  }
  0x48   :  { %v1565_v33 = vld [vmem:[#allocation6 + $0x22c] ss:$12 sps:$4 sm:$0xff]  }
  0x49   :  { %1011 = vmatmul.mubr.bf16.vlgmr.msra.gmra.mrb[0].mxu1 %v1731_v34  ;;  %909 = vmatpush1.bf16.msra.mxu0 %v1488_v36  ;;  %v1563_v36 = vld [vmem:[#allocation6 + $0x228] ss:$12 sps:$4 sm:$0xff]  }
  0x4a   :  { %1344 = vmatpush3.bf16.msra.mxu1 %v1489_v37  ;;  %910 = vmatprep.subr.bf16.mxu0 %v1490_v38  ;;  %v1567_v37 = vld [vmem:[#allocation6 + $0x230] ss:$12 sps:$4 sm:$0xff]  }
  0x4b   :  { %1345 = vmatprep.subr.bf16.mxu1 %v1492_v39  ;;  %1053 = vmatprep.mubr.bf16.mxu1 %v1527_v56  ;;  %v1573_v38 = vld [vmem:[#allocation6 + $0x244] ss:$12 sps:$4 sm:$0xff]   ;;  %v1568_v39 = vld [vmem:[#allocation3 + $0x8] ss:$20 sps:$4 sm:$0xff]  }
  0x4c   :  { %v1591_v56 = vld [vmem:[#allocation6 + $0x2b8] ss:$12 sps:$4 sm:$0xff]  }
  0x4d   :  { %911 = vmatpush1.bf16.msra.mxu0 %v1493_v40  ;;  %v1571_v40 = vld [vmem:[#allocation6 + $0x240] ss:$12 sps:$4 sm:$0xff]  }
  0x4e   :  { %1346 = vmatpush3.bf16.msra.mxu1 %v1494_v41  ;;  %912 = vmatprep.subr.bf16.mxu0 %v1495_v42  ;;  %v1574_v41 = vld [vmem:[#allocation6 + $0x308] ss:$12 sps:$4 sm:$0xff]   ;;  %v1682_v42 = vmov 0.0  }
  0x4f   :  { %1347 = vmatprep.subr.bf16.mxu1 %v1497_v43  ;;  %v1577_v43 = vld [vmem:[#allocation6 + $0x25c] ss:$12 sps:$4 sm:$0xff]  }
  0x51   :  { %913 = vmatpush1.bf16.msra.mxu0 %v1498_v44  ;;  %v1575_v44 = vld [vmem:[#allocation6 + $0x258] ss:$12 sps:$4 sm:$0xff]  }
  0x52   :  { %1348 = vmatpush3.bf16.msra.mxu1 %v1499_v45  ;;  %914 = vmatprep.subr.bf16.mxu0 %v1500_v46  ;;  %v1578_v45 = vld [vmem:[#allocation6 + $0x320] ss:$12 sps:$4 sm:$0xff]  }
  0x53   :  { %1349 = vmatprep.subr.bf16.mxu1 %v1502_v47  ;;  %v1581_v46 = vld [vmem:[#allocation6 + $0x274] ss:$12 sps:$4 sm:$0xff]   ;;  %v1579_v47 = vld [vmem:[#allocation6 + $0x270] ss:$12 sps:$4 sm:$0xff]  }
  0x55   :  { %915 = vmatpush1.bf16.msra.mxu0 %v1503_v48  ;;  %v1582_v48 = vld [vmem:[#allocation6 + $0x338] ss:$12 sps:$4 sm:$0xff]  }
  0x56   :  { %1350 = vmatpush3.bf16.msra.mxu1 %v1504_v49  ;;  %916 = vmatprep.subr.bf16.mxu0 %v1505_v50  ;;  %v1585_v49 = vld [vmem:[#allocation6 + $0x28c] ss:$12 sps:$4 sm:$0xff]   ;;  %v1583_v50 = vld [vmem:[#allocation6 + $0x288] ss:$12 sps:$4 sm:$0xff]  }
  0x57   :  { %1351 = vmatprep.subr.bf16.mxu1 %v1507_v51  ;;  %v1586_v51 = vld [vmem:[#allocation6 + $0x350] ss:$12 sps:$4 sm:$0xff]  }
  0x59   :  { %917 = vmatpush1.bf16.msra.mxu0 %v1508_v52  ;;  %v1589_v52 = vld [vmem:[#allocation6 + $0x2a4] ss:$12 sps:$4 sm:$0xff]  }
  0x5a   :  { %1352 = vmatpush3.bf16.msra.mxu1 %v1509_v53  ;;  %918 = vmatprep.subr.bf16.mxu0 %v1510_v54  ;;  %v1587_v53 = vld [vmem:[#allocation6 + $0x2a0] ss:$12 sps:$4 sm:$0xff]   ;;  %v1590_v54 = vld [vmem:[#allocation6 + $0x368] ss:$12 sps:$4 sm:$0xff]  }
  0x5b   :  { %1353 = vmatprep.subr.bf16.mxu1 %v1512_v55  ;;  %v1593_v55 = vld [vmem:[#allocation6 + $0x2bc] ss:$12 sps:$4 sm:$0xff]  }
  0x5d   :  { %919 = vmatpush1.bf16.msra.mxu0 %v1513_v57  ;;  %v1594_v57 = vld [vmem:[#allocation6 + $0x380] ss:$12 sps:$4 sm:$0xff]  }
  0x5e   :  { %1354 = vmatpush3.bf16.msra.mxu1 %v1514_v58  ;;  %920 = vmatprep.subr.bf16.mxu0 %v1515_v59  ;;  %v1597_v58 = vld [vmem:[#allocation6 + $0x2d4] ss:$12 sps:$4 sm:$0xff]   ;;  %v1595_v59 = vld [vmem:[#allocation6 + $0x2d0] ss:$12 sps:$4 sm:$0xff]  }
  0x5f   :  { %1355 = vmatprep.subr.bf16.mxu1 %v1517_v60  ;;  %v1598_v60 = vld [vmem:[#allocation6 + $0x398] ss:$12 sps:$4 sm:$0xff]  }
  0x61   :  { %921 = vmatpush1.bf16.msra.mxu0 %v1518_v61  ;;  %v1601_v61 = vld [vmem:[#allocation6 + $0x2ec] ss:$12 sps:$4 sm:$0xff]  }
  0x62   :  { %1356 = vmatpush3.bf16.msra.mxu1 %v1519_v62  ;;  %922 = vmatprep.subr.bf16.mxu0 %v1520_v63  ;;  %v1599_v62 = vld [vmem:[#allocation6 + $0x2e8] ss:$12 sps:$4 sm:$0xff]   ;;  %v1602_v63 = vld [vmem:[#allocation6 + $0x3b0] ss:$12 sps:$4 sm:$0xff]  }
  0x63   :  { %1357 = vmatprep.subr.bf16.mxu1 %v1522_v0 }
  0x65   :  { %923 = vmatpush1.bf16.msra.mxu0 %v1523_v1 }
  0x66   :  { %1358 = vmatpush3.bf16.msra.mxu1 %v1524_v2  ;;  %935 = vmatprep.subr.bf16.mxu0 %v1530_v3 }
  0x67   :  { %1365 = vmatprep.subr.bf16.mxu1 %v1531_v4 }
  0x68   :  { %925 = vmatmul.mubr.bf16.vlgmr.msra.gmra.mrb[0].mxu0 %v1525_v5 }
  0x69   :  { %1054 = vmatmul.mubr.bf16.vlgmr.msra.gmra.mrb[4].mxu1 %v1525_v5  ;;  %936 = vmatpush1.bf16.msra.mxu0 %v1528_v6 }
  0x6a   :  { %1366 = vmatpush3.bf16.msra.mxu1 %v1532_v7  ;;  %937 = vmatprep.subr.bf16.mxu0 %v1535_v8 }
  0x6b   :  { %1367 = vmatprep.subr.bf16.mxu1 %v1536_v9  ;;  %1094 = vmatprep.mubr.bf16.mxu1 %v1570_v22 }
  0x6c   :  { %967 = vmatprep.mubr.bf16.mxu0 %v1570_v22 }
  0x6d   :  { %938 = vmatpush1.bf16.msra.mxu0 %v1533_v10 }
  0x6e   :  { %1368 = vmatpush3.bf16.msra.mxu1 %v1537_v11  ;;  %939 = vmatprep.subr.bf16.mxu0 %v1540_v12 }
  0x6f   :  { %1369 = vmatprep.subr.bf16.mxu1 %v1541_v13 }
  0x71   :  { %940 = vmatpush1.bf16.msra.mxu0 %v1538_v14 }
  0x72   :  { %1370 = vmatpush3.bf16.msra.mxu1 %v1542_v15  ;;  %941 = vmatprep.subr.bf16.mxu0 %v1545_v16 }
  0x73   :  { %1371 = vmatprep.subr.bf16.mxu1 %v1546_v17 }
  0x75   :  { %942 = vmatpush1.bf16.msra.mxu0 %v1543_v18  ;;  %v1167_v18 = vlaneseq }
  0x76   :  { %1372 = vmatpush3.bf16.msra.mxu1 %v1547_v19  ;;  %943 = vmatprep.subr.bf16.mxu0 %v1550_v20 }
  0x77   :  { %1373 = vmatprep.subr.bf16.mxu1 %v1551_v21  ;;  %v1165_v21 = vld [vmem:[%s1752_s2] sm:$0x7]  ;;  %s1684_s2 = smov [#allocation8]  }
  0x78   :  { %s1205_s13 = sshll.u32 %s1684_s2, 4  ;;  %s1206_s13 = int_to_ptr.vmem [resolvable:$true] %s1205_s13 }
  0x79   :  { %944 = vmatpush1.bf16.msra.mxu0 %v1548_v23  ;;  %s1647_s14 = scalar_lea.vmem %s1206_s13, 768  ;;  %p1652_p3 = scmp.lt.s32.totalorder %s1206_s13, %s1206_s13 }
  0x7a   :  { %1374 = vmatpush3.bf16.msra.mxu1 %v1552_v24  ;;  %945 = vmatprep.subr.bf16.mxu0 %v1555_v25  ;;  %p1648_p2 = scmp.ne.s32.totalorder %s1206_s13, %s1647_s14  ;;  %p1653_p4 = scmp.lt.s32.totalorder %s1647_s14, %s1647_s14 }
  0x7b   :  { %1375 = vmatprep.subr.bf16.mxu1 %v1556_v26 }
  0x7c   :  { %p1654_p5 = por %p1653_p4, %p1652_p3 }
  0x7d   :  { %946 = vmatpush1.bf16.msra.mxu0 %v1553_v27 }
  0x7e   :  { %1376 = vmatpush3.bf16.msra.mxu1 %v1557_v28  ;;  %947 = vmatprep.subr.bf16.mxu0 %v1560_v29  ;;  %p1655_p6 = pnand %p1654_p5, %p1648_p2 }
  0x7f   :  { %1377 = vmatprep.subr.bf16.mxu1 %v1561_v30 }
  0x81   :  { %948 = vmatpush1.bf16.msra.mxu0 %v1558_v31 }
  0x82   :  { %1378 = vmatpush3.bf16.msra.mxu1 %v1562_v32  ;;  %949 = vmatprep.subr.bf16.mxu0 %v1565_v33 }
  0x83   :  { %1379 = vmatprep.subr.bf16.mxu1 %v1566_v35 }
  0x85   :  { %950 = vmatpush1.bf16.msra.mxu0 %v1563_v36 }
  0x86   :  { %1380 = vmatpush3.bf16.msra.mxu1 %v1567_v37  ;;  %951 = vmatprep.subr.bf16.mxu0 %v1573_v38 }
  0x87   :  { %1396 = vmatprep.subr.bf16.mxu1 %v1682_v42 }
  0x89   :  { %1095 = vmatmul.mubr.bf16.vlgmr.msra.gmra.mrb[8].mxu1 %v1568_v39  ;;  %952 = vmatpush1.bf16.msra.mxu0 %v1571_v40 }
  0x8a   :  { %1397 = vmatpush3.bf16.msra.mxu1 %v1574_v41  ;;  %953 = vmatprep.subr.bf16.mxu0 %v1577_v43 }
  0x8b   :  { %1398 = vmatprep.subr.bf16.mxu1 %v1682_v42  ;;  %1412 = vmatprep.mubr.msk.bf16.mxu1 %vm1683_vm0, %v1682_v42 }
  0x8d   :  { %954 = vmatpush1.bf16.msra.mxu0 %v1575_v44 }
  0x8e   :  { %1399 = vmatpush3.bf16.msra.mxu1 %v1578_v45  ;;  %955 = vmatprep.subr.bf16.mxu0 %v1581_v46 }
  0x8f   :  { %1400 = vmatprep.subr.bf16.mxu1 %v1682_v42 }
  0x91   :  { %956 = vmatpush1.bf16.msra.mxu0 %v1579_v47 }
  0x92   :  { %1401 = vmatpush3.bf16.msra.mxu1 %v1582_v48  ;;  %957 = vmatprep.subr.bf16.mxu0 %v1585_v49 }
  0x93   :  { %1402 = vmatprep.subr.bf16.mxu1 %v1682_v42 }
  0x95   :  { %958 = vmatpush1.bf16.msra.mxu0 %v1583_v50 }
  0x96   :  { %1403 = vmatpush3.bf16.msra.mxu1 %v1586_v51  ;;  %959 = vmatprep.subr.bf16.mxu0 %v1589_v52 }
  0x97   :  { %1404 = vmatprep.subr.bf16.mxu1 %v1682_v42 }
  0x99   :  { %960 = vmatpush1.bf16.msra.mxu0 %v1587_v53 }
  0x9a   :  { %1405 = vmatpush3.bf16.msra.mxu1 %v1590_v54  ;;  %961 = vmatprep.subr.bf16.mxu0 %v1593_v55 }
  0x9b   :  { %1406 = vmatprep.subr.bf16.mxu1 %v1682_v42 }
  0x9d   :  { %962 = vmatpush1.bf16.msra.mxu0 %v1591_v56 }
  0x9e   :  { %1407 = vmatpush3.bf16.msra.mxu1 %v1594_v57  ;;  %963 = vmatprep.subr.bf16.mxu0 %v1597_v58 }
  0x9f   :  { %1408 = vmatprep.subr.bf16.mxu1 %v1682_v42 }
  0xa1   :  { %964 = vmatpush1.bf16.msra.mxu0 %v1595_v59 }
  0xa2   :  { %1409 = vmatpush3.bf16.msra.mxu1 %v1598_v60  ;;  %965 = vmatprep.subr.bf16.mxu0 %v1601_v61 }
  0xa3   :  { %1410 = vmatprep.subr.bf16.mxu1 %v1682_v42 }
  0xa5   :  { %966 = vmatpush1.bf16.msra.mxu0 %v1599_v62 }
  0xa6   :  { %1411 = vmatpush3.bf16.msra.mxu1 %v1602_v63 }
  0xa8   :  { %968 = vmatmul.mubr.bf16.vlgmr.msra.gmra.mrb[0].mxu0 %v1568_v39 }
  0xa9   :  { %1413 = vmatmul.mubr.bf16.vlgmr.msra.gmra.mrb[12].mxu1 %v1731_v34  ;;  %v1168_v34 = vshrl.u32 %v1167_v18, 7 }
  0xab   :  { %v1169_v19 = vsub.s32 0, %v1168_v34  ;;  %v1177_v20 = vsub.s32 2, %v1168_v34  ;;  %v1173_v22 = vsub.s32 1, %v1168_v34 }
  0xad   :  { %v1170_v23 = vrot.slane %v1165_v21, %v1169_v19  ;;  %v1178_v24 = vrot.slane %v1165_v21, %v1177_v20  ;;  %v1174_v27 = vrot.slane %v1165_v21, %v1173_v22 }
 0x11c   :  { %v1012_v0 = vpop.f32.mrb[0].mxu1 }
 0x11d   :  { %v1014_v1 = vpop.f32.mrb[1].mxu1 }
 0x11e   :  { %v1016_v2 = vpop.f32.mrb[2].mxu1 }
 0x11f   :  { %v1018_v3 = vpop.f32.mrb[3].mxu1 }
 0x13c   :  { %v1359_v4 = vpop.f32.mrb[4].mxu1 }
 0x13d   :  { %v1360_v5 = vpop.f32.mrb[5].mxu1 }
 0x13e   :  { %v1361_v6 = vadd.f32 %v1360_v5, %v1359_v4  ;;  %v1362_v7 = vpop.f32.mrb[6].mxu1 }
 0x13f   :  { %v1363_v8 = vpop.f32.mrb[7].mxu1 }
 0x140   :  { %v1364_v9 = vadd.f32 %v1363_v8, %v1362_v7 }
 0x15c   :  { %v1381_v10 = vpop.f32.mrb[8].mxu1 }
 0x15d   :  { %v1382_v11 = vpop.f32.mrb[9].mxu1 }
 0x15e   :  { %v1383_v12 = vadd.f32 %v1382_v11, %v1381_v10  ;;  %v1384_v13 = vpop.f32.mrb[10].mxu1 }
 0x15f   :  { %v1385_v14 = vpop.f32.mrb[11].mxu1 }
 0x160   :  { %v1386_v15 = vadd.f32 %v1385_v14, %v1384_v13  ;;  %v1097_v16 = vadd.f32 %v1383_v12, %v1361_v6 }
 0x162   :  { %v1100_v17 = vadd.f32 %v1386_v15, %v1364_v9 }
 0x17b   :  { %v969_v25 = vpop.f32.mrb[0].mxu0 }
 0x17c   :  { %v1137_v26 = vpop.f32.mrb[12].mxu1  ;;  %v1416_v28 = vadd.f32 %v1012_v0, %v969_v25  ;;  %v971_v30 = vpop.f32.mrb[1].mxu0 }
 0x17d   :  { %v1138_v29 = vadd.f32 %v1137_v26, %v1097_v16  ;;  %v1414_v31 = vpop.f32.mrb[13].mxu1  ;;  %v1417_v32 = vadd.f32 %v1014_v1, %v971_v30  ;;  %v973_v33 = vpop.f32.mrb[2].mxu0 }
 0x17e   :  { %v1140_v35 = vpop.f32.mrb[14].mxu1  ;;  %v1182_v36 = vadd.f32 %v1416_v28, %v1170_v23  ;;  %v1418_v38 = vadd.f32 %v1016_v2, %v973_v33  ;;  %v975_v40 = vpop.f32.mrb[3].mxu0 }
 0x17f   :  { %v1184_v37 = vadd.f32 %v1178_v24, %v1138_v29  ;;  %v1141_v39 = vadd.f32 %v1140_v35, %v1100_v17  ;;  %v1415_v41 = vpop.f32.mrb[15].mxu1  ;;  %v1183_v42 = vadd.f32 %v1417_v32, %v1174_v27  ;;  %v1419_v43 = vadd.f32 %v1018_v3, %v975_v40 }
 0x180   :  { %v1188_v44 = vmax.f32 %v1182_v36, 0.0  ;;  %v1185_v46 = vadd.f32 %v1418_v38, %v1170_v23 }
 0x181   :  { %v1190_v45 = vmax.f32 %v1184_v37, 0.0  ;;  %v1187_v47 = vadd.f32 %v1178_v24, %v1141_v39  ;;  %v1189_v48 = vmax.f32 %v1183_v42, 0.0  ;;  %v1186_v49 = vadd.f32 %v1419_v43, %v1174_v27 }
 0x182   :  { %1194 = vst [vmem:[#allocation8] sm:$0xff] %v1188_v44  ;;  %v1191_v50 = vmax.f32 %v1185_v46, 0.0 }
 0x183   :  { %1196 = vst [vmem:[#allocation8 + $0x10] sm:$0xff] %v1190_v45  ;;  %v1193_v51 = vmax.f32 %v1187_v47, 0.0  ;;  %1195 = vst [vmem:[#allocation8 + $0x8] sm:$0xff] %v1189_v48  ;;  %v1192_v52 = vmax.f32 %v1186_v49, 0.0 }
 0x184   :  { %1197 = vst [vmem:[#allocation8 + $0x18] sm:$0xff] %v1191_v50 }
 0x185   :  { %1199 = vst [vmem:[#allocation8 + $0x28] sm:$0xff] %v1193_v51  ;;  %1198 = vst [vmem:[#allocation8 + $0x20] sm:$0xff] %v1192_v52 }
 0x186   :  { %1658 = shalt.err (!%p1655_p6)
}
 0x187   :  { %s1659_s17 = scalar_lea.hbm %s1753_s3, 768 }
 0x188   :  { %p1660_p7 = scmp.ne.s32.totalorder %s1753_s3, %s1659_s17  ;;  %p1663_p8 = scmp.lt.u32.totalorder %s1659_s17, %s1753_s3 }
 0x18a   :  { %p1665_p9 = pnand %p1663_p8, %p1660_p7 }
 0x18c   :  { %1668 = shalt.err (!%p1665_p9)
}
 0x18d   :  { %s1685_s22 = smov 384   ;;  %s1686_s23 = smov 24  }
 0x18e   :  { %1211 = dma.vmem_to_hbm [thread:$0]  %s1206_s13, 768, %s1753_s3, [#allocation5], %s1685_s22, %s1685_s22, %s1686_s23  }
 0x18f   :  { %1673 = dma.done.wait [#allocation5], 768  }
 0x190   :  { %1674 = vsyncadd [#allocation5], 4294966528 }
 0x191   :  { %1215 = vsyncpa [#allocation4], 1 }
 0x192   :  { %1216 = vsyncpa [#allocation7], 1 }
 0x193   :  { %1217 = vsyncpa [#allocation5], 1 }

</bundles_post_ra>
